<compile_context>
chip_gen: v6e
topology: v6e:2x2x1
jax: 0.10.0
libtpu: 0.0.40
codegen_flags: <defaults>
</compile_context>

<pallas_src>
import functools

import jax
import jax.numpy as jnp
from jax.experimental import pallas as pl
from jax.experimental.pallas import tpu as pltpu

KSIZE = 3  # spatial_attn_layer(kernel_size=3)


def _round_up(v, m):
    return ((v + m - 1) // m) * m


def spatial_attn_kernel(w_ref, edge_ref, x_ref, o_ref, pad_ref,
                        *, C, H, W, PAD, CCHUNK):
    """One batch element per grid step.

    w_ref    : SMEM (2*KSIZE*KSIZE,) f32  conv weights [max-plane taps, mean-plane taps]
    edge_ref : VMEM (2, H*W) f32          [left_ok, right_ok] column-edge masks
    x_ref    : VMEM (C, H*W)              input, spatial dims flattened (lane-dense)
    o_ref    : VMEM (C, H*W)              output
    pad_ref  : VMEM (2, PAD + H*W + PAD) f32  zero-padded flat [max, mean] planes
    """
    HW = H * W
    num_chunks = C // CCHUNK
    use_fori = (C % CCHUNK == 0) and (num_chunks > 8)

    # ---- ChannelPool: fused single pass over C (running max / running f32 sum) ----
    if use_fori:
        x0 = x_ref[0:CCHUNK, :]
        cmax = jnp.max(x0, axis=0, keepdims=True)
        csum = jnp.sum(x0.astype(jnp.float32), axis=0, keepdims=True)

        def pool_body(i, carry):
            cm, cs = carry
            c0 = pl.multiple_of(i * CCHUNK, CCHUNK)
            xc = x_ref[pl.ds(c0, CCHUNK), :]
            cm = jnp.maximum(cm, jnp.max(xc, axis=0, keepdims=True))
            cs = cs + jnp.sum(xc.astype(jnp.float32), axis=0, keepdims=True)
            return cm, cs

        cmax, csum = jax.lax.fori_loop(1, num_chunks, pool_body, (cmax, csum),
                                       unroll=2)
    else:
        cmax = None
        csum = None
        for c0 in range(0, C, CCHUNK):
            cb = min(CCHUNK, C - c0)
            xc = x_ref[c0:c0 + cb, :]
            pmax = jnp.max(xc, axis=0, keepdims=True)                  # native dtype
            psum = jnp.sum(xc.astype(jnp.float32), axis=0, keepdims=True)
            cmax = pmax if cmax is None else jnp.maximum(cmax, pmax)
            csum = psum if csum is None else csum + psum

    cmax = cmax.astype(jnp.float32)
    cmean = csum * (1.0 / C)

    # ---- write pooled planes into the flat padded scratch; zero only the pads ----
    zeros_pad = jnp.zeros((2, PAD), jnp.float32)
    pad_ref[:, 0:PAD] = zeros_pad
    pad_ref[:, PAD + HW:PAD + HW + PAD] = zeros_pad
    pad_ref[0:1, PAD:PAD + HW] = cmax
    pad_ref[1:2, PAD:PAD + HW] = cmean

    left_ok = edge_ref[0:1, :]    # 1.0 except 0.0 where col == 0
    right_ok = edge_ref[1:2, :]   # 1.0 except 0.0 where col == W-1

    # ---- 3x3 conv (2 -> 1, no bias): 9 shifted MACs, taps grouped by kw so the
    #      column-edge masks are applied with only 2 multiplies total ----
    KK = KSIZE * KSIZE
    acc_mid = jnp.zeros((1, HW), jnp.float32)
    acc_left = jnp.zeros((1, HW), jnp.float32)
    acc_right = jnp.zeros((1, HW), jnp.float32)
    for kh in range(KSIZE):
        for kw in range(KSIZE):
            off = PAD + (kh - 1) * W + (kw - 1)          # static, always in-bounds
            tap = (w_ref[kh * KSIZE + kw] * pad_ref[0:1, off:off + HW]
                   + w_ref[KK + kh * KSIZE + kw] * pad_ref[1:2, off:off + HW])
            if kw == 0:            # reads column j-1: invalid (zero pad) at j == 0
                acc_left = acc_left + tap
            elif kw == KSIZE - 1:  # reads column j+1: invalid at j == W-1
                acc_right = acc_right + tap
            else:
                acc_mid = acc_mid + tap
    acc = acc_mid + acc_left * left_ok + acc_right * right_ok

    scale = jax.nn.sigmoid(acc)                                       # (1, HW) f32

    # ---- gate: out = x * scale.  Broadcast/cast of scale hoisted out of the loop;
    #      multiply kept in the input dtype; chunked sublane-aligned stores. ----
    BC = min(CCHUNK, C)
    scale_b = jnp.broadcast_to(scale.astype(o_ref.dtype), (BC, HW))
    if use_fori:
        def gate_body(i, _):
            c0 = pl.multiple_of(i * CCHUNK, CCHUNK)
            o_ref[pl.ds(c0, CCHUNK), :] = (
                x_ref[pl.ds(c0, CCHUNK), :] * scale_b).astype(o_ref.dtype)
            return 0

        jax.lax.fori_loop(0, num_chunks, gate_body, 0, unroll=4)
    else:
        for c0 in range(0, C, CCHUNK):
            cb = min(CCHUNK, C - c0)
            sb = scale_b if cb == BC else scale_b[:cb]
            o_ref[c0:c0 + cb, :] = (x_ref[c0:c0 + cb, :] * sb).astype(o_ref.dtype)


def spatial_attn_layer(x, conv_w):
    """x: (N, C, H, W); conv_w: (1, 2, KSIZE, KSIZE) OIHW, no bias."""
    N, C, H, W = x.shape
    HW = H * W
    PAD = _round_up(W + 1, 128)           # flat zero pad >= one padded row, lane-aligned
    L = PAD + HW + PAD
    itemsize = jnp.dtype(x.dtype).itemsize
    cchunk = max(8, 32 // itemsize)       # dtype-aware: 8 f32 / 16 bf16 / 32 int8

    # trailing-dim merge: no data movement in XLA
    x_flat = x.reshape(N, C, HW)
    w_flat = conv_w.reshape(-1).astype(jnp.float32)                   # (18,)

    # column-edge validity masks (tiny, computed once per call in the wrapper;
    # kept as an input to avoid in-kernel integer-mod iota plumbing)
    col = jnp.arange(HW, dtype=jnp.int32) % W
    edge = jnp.stack([(col != 0), (col != W - 1)], axis=0).astype(jnp.float32)

    # real buffer footprint: double-buffered in + out blocks, scratch, edge, headroom
    vmem_bytes = 4 * C * HW * itemsize + 2 * L * 4 + 4 * HW * 4 + (4 << 20)
    vmem_limit = int(min(max(vmem_bytes, 32 << 20), 128 << 20))

    kernel = functools.partial(spatial_attn_kernel, C=C, H=H, W=W, PAD=PAD,
                               CCHUNK=cchunk)
    out_flat = pl.pallas_call(
        kernel,
        out_shape=jax.ShapeDtypeStruct((N, C, HW), x.dtype),
        grid=(N,),
        in_specs=[
            pl.BlockSpec(memory_space=pltpu.MemorySpace.SMEM),   # conv weights (scalars)
            pl.BlockSpec((2, HW), lambda b: (0, 0)),             # edge masks (grid-invariant)
            pl.BlockSpec((None, C, HW), lambda b: (b, 0, 0)),    # x, one batch element / step
        ],
        out_specs=pl.BlockSpec((None, C, HW), lambda b: (b, 0, 0)),
        scratch_shapes=[pltpu.VMEM((2, L), jnp.float32)],
        compiler_params=pltpu.CompilerParams(
            dimension_semantics=("parallel",),
            vmem_limit_bytes=vmem_limit),
    )(w_flat, edge, x_flat)

    return out_flat.reshape(N, C, H, W)


def _reference(x, conv_w):
    # pure-JAX reference of the PyTorch forward
    cmax = jnp.max(x, axis=1, keepdims=True)
    cmean = jnp.mean(x, axis=1, keepdims=True)
    comp = jnp.concatenate([cmax, cmean], axis=1)                     # (N, 2, H, W)
    out = jax.lax.conv_general_dilated(
        comp, conv_w, window_strides=(1, 1),
        padding=((1, 1), (1, 1)),
        dimension_numbers=("NCHW", "OIHW", "NCHW"),
        precision=jax.lax.Precision.HIGHEST)                          # (N, 1, H, W)
    return x * jax.nn.sigmoid(out)


if __name__ == "__main__":
    key = jax.random.PRNGKey(0)
    kx, kw = jax.random.split(key)

    N, C, H, W = 2, 4, 16, 16
    x = jax.random.normal(kx, (N, C, H, W), dtype=jnp.float32)
    # deterministic "Conv2d(2, 1, 3, bias=False)" weight, OIHW = (1, 2, 3, 3)
    conv_w = 0.3 * jax.random.normal(kw, (1, 2, KSIZE, KSIZE), dtype=jnp.float32)

    out = jax.block_until_ready(spatial_attn_layer(x, conv_w))

    ref = _reference(x, conv_w)
    assert out.shape == (N, C, H, W)
    assert jnp.allclose(out, ref, rtol=1e-4, atol=1e-4), "mismatch vs JAX reference"

    print("KERNEL_OK")
</pallas_src>

<mosaic_0001>
module attributes {stable_mosaic.version = 11 : i64} {
  func.func @spatial_attn_kernel(%arg0: i32, %arg1: memref<18xf32, #tpu.memory_space<smem>>, %arg2: memref<2x256xf32, #tpu.memory_space<vmem>>, %arg3: memref<1x4x256xf32, #tpu.memory_space<vmem>>, %arg4: memref<1x4x256xf32, #tpu.memory_space<vmem>>, %arg5: memref<2x512xf32, #tpu.memory_space<vmem>>) attributes {dimension_semantics = [#tpu.dimension_semantics<parallel>], iteration_bounds = array<i64: 2>, scalar_prefetch = 0 : i64, scratch_operands = 1 : i64, tpu.core_type = #tpu.core_type<tc>, window_params = [{transform_indices = @transform_0, window_bounds = array<i64: 18>}, {pipeline_mode = #tpu.pipeline_mode<synchronous>, transform_indices = @transform_1, window_bounds = array<i64: 2, 256>}, {transform_indices = @transform_2, window_bounds = array<i64: 1, 4, 256>}, {transform_indices = @transform_3, window_bounds = array<i64: 1, 4, 256>}]} {
    %c0 = arith.constant 0 : index
    %c0_0 = arith.constant 0 : index
    %c0_1 = arith.constant 0 : index
    %0 = vector.load %arg3[%c0, %c0_0, %c0_1] : memref<1x4x256xf32, #tpu.memory_space<vmem>>, vector<1x4x256xf32>
    %1 = vector.shape_cast %0 : vector<1x4x256xf32> to vector<4x256xf32>
    %cst = arith.constant dense<0xFF800000> : vector<256xf32>
    %2 = vector.multi_reduction <maximumf>, %1, %cst [0] : vector<4x256xf32> to vector<256xf32>
    %3 = vector.shape_cast %2 : vector<256xf32> to vector<1x256xf32>
    %cst_2 = arith.constant dense<0.000000e+00> : vector<256xf32>
    %4 = vector.multi_reduction <add>, %1, %cst_2 [0] : vector<4x256xf32> to vector<256xf32>
    %5 = vector.shape_cast %4 : vector<256xf32> to vector<1x256xf32>
    %cst_3 = arith.constant 2.500000e-01 : f32
    %6 = vector.broadcast %cst_3 : f32 to vector<1x256xf32>
    %7 = arith.mulf %5, %6 : vector<1x256xf32>
    %cst_4 = arith.constant 0.000000e+00 : f32
    %8 = vector.broadcast %cst_4 : f32 to vector<2x128xf32>
    %c0_5 = arith.constant 0 : index
    %c0_6 = arith.constant 0 : index
    %9 = vector.load %arg5[%c0_5, %c0_6] : memref<2x512xf32, #tpu.memory_space<vmem>>, vector<2x128xf32>
    tpu.vector_store %arg5[%c0_5, %c0_6], %8 {strides = array<i32>} : memref<2x512xf32, #tpu.memory_space<vmem>>, vector<2x128xf32>,
    %c0_7 = arith.constant 0 : index
    %c384 = arith.constant 384 : index
    %10 = vector.load %arg5[%c0_7, %c384] : memref<2x512xf32, #tpu.memory_space<vmem>>, vector<2x128xf32>
    tpu.vector_store %arg5[%c0_7, %c384], %8 {strides = array<i32>} : memref<2x512xf32, #tpu.memory_space<vmem>>, vector<2x128xf32>,
    %c0_8 = arith.constant 0 : index
    %c128 = arith.constant 128 : index
    %11 = vector.load %arg5[%c0_8, %c128] : memref<2x512xf32, #tpu.memory_space<vmem>>, vector<1x256xf32>
    tpu.vector_store %arg5[%c0_8, %c128], %3 {strides = array<i32>} : memref<2x512xf32, #tpu.memory_space<vmem>>, vector<1x256xf32>,
    %c1 = arith.constant 1 : index
    %c128_9 = arith.constant 128 : index
    %12 = vector.load %arg5[%c1, %c128_9] : memref<2x512xf32, #tpu.memory_space<vmem>>, vector<1x256xf32>
    tpu.vector_store %arg5[%c1, %c128_9], %7 {strides = array<i32>} : memref<2x512xf32, #tpu.memory_space<vmem>>, vector<1x256xf32>,
    %c0_10 = arith.constant 0 : index
    %c0_11 = arith.constant 0 : index
    %13 = vector.load %arg2[%c0_10, %c0_11] : memref<2x256xf32, #tpu.memory_space<vmem>>, vector<1x256xf32>
    %c1_12 = arith.constant 1 : index
    %c0_13 = arith.constant 0 : index
    %14 = vector.load %arg2[%c1_12, %c0_13] : memref<2x256xf32, #tpu.memory_space<vmem>>, vector<1x256xf32>
    %cst_14 = arith.constant 0.000000e+00 : f32
    %15 = vector.broadcast %cst_14 : f32 to vector<1x256xf32>
    %cst_15 = arith.constant 0.000000e+00 : f32
    %16 = vector.broadcast %cst_15 : f32 to vector<1x256xf32>
    %cst_16 = arith.constant 0.000000e+00 : f32
    %17 = vector.broadcast %cst_16 : f32 to vector<1x256xf32>
    %c0_17 = arith.constant 0 : index
    %18 = memref.load %arg1[%c0_17] : memref<18xf32, #tpu.memory_space<smem>>
    %c0_18 = arith.constant 0 : index
    %c111 = arith.constant 111 : index
    %19 = vector.load %arg5[%c0_18, %c111] : memref<2x512xf32, #tpu.memory_space<vmem>>, vector<1x256xf32>
    %20 = vector.broadcast %18 : f32 to vector<1x256xf32>
    %21 = arith.mulf %20, %19 : vector<1x256xf32>
    %c9 = arith.constant 9 : index
    %22 = memref.load %arg1[%c9] : memref<18xf32, #tpu.memory_space<smem>>
    %c1_19 = arith.constant 1 : index
    %c111_20 = arith.constant 111 : index
    %23 = vector.load %arg5[%c1_19, %c111_20] : memref<2x512xf32, #tpu.memory_space<vmem>>, vector<1x256xf32>
    %24 = vector.broadcast %22 : f32 to vector<1x256xf32>
    %25 = arith.mulf %24, %23 : vector<1x256xf32>
    %26 = arith.addf %21, %25 : vector<1x256xf32>
    %27 = arith.addf %16, %26 : vector<1x256xf32>
    %c1_21 = arith.constant 1 : index
    %28 = memref.load %arg1[%c1_21] : memref<18xf32, #tpu.memory_space<smem>>
    %c0_22 = arith.constant 0 : index
    %c112 = arith.constant 112 : index
    %29 = vector.load %arg5[%c0_22, %c112] : memref<2x512xf32, #tpu.memory_space<vmem>>, vector<1x256xf32>
    %30 = vector.broadcast %28 : f32 to vector<1x256xf32>
    %31 = arith.mulf %30, %29 : vector<1x256xf32>
    %c10 = arith.constant 10 : index
    %32 = memref.load %arg1[%c10] : memref<18xf32, #tpu.memory_space<smem>>
    %c1_23 = arith.constant 1 : index
    %c112_24 = arith.constant 112 : index
    %33 = vector.load %arg5[%c1_23, %c112_24] : memref<2x512xf32, #tpu.memory_space<vmem>>, vector<1x256xf32>
    %34 = vector.broadcast %32 : f32 to vector<1x256xf32>
    %35 = arith.mulf %34, %33 : vector<1x256xf32>
    %36 = arith.addf %31, %35 : vector<1x256xf32>
    %37 = arith.addf %15, %36 : vector<1x256xf32>
    %c2 = arith.constant 2 : index
    %38 = memref.load %arg1[%c2] : memref<18xf32, #tpu.memory_space<smem>>
    %c0_25 = arith.constant 0 : index
    %c113 = arith.constant 113 : index
    %39 = vector.load %arg5[%c0_25, %c113] : memref<2x512xf32, #tpu.memory_space<vmem>>, vector<1x256xf32>
    %40 = vector.broadcast %38 : f32 to vector<1x256xf32>
    %41 = arith.mulf %40, %39 : vector<1x256xf32>
    %c11 = arith.constant 11 : index
    %42 = memref.load %arg1[%c11] : memref<18xf32, #tpu.memory_space<smem>>
    %c1_26 = arith.constant 1 : index
    %c113_27 = arith.constant 113 : index
    %43 = vector.load %arg5[%c1_26, %c113_27] : memref<2x512xf32, #tpu.memory_space<vmem>>, vector<1x256xf32>
    %44 = vector.broadcast %42 : f32 to vector<1x256xf32>
    %45 = arith.mulf %44, %43 : vector<1x256xf32>
    %46 = arith.addf %41, %45 : vector<1x256xf32>
    %47 = arith.addf %17, %46 : vector<1x256xf32>
    %c3 = arith.constant 3 : index
    %48 = memref.load %arg1[%c3] : memref<18xf32, #tpu.memory_space<smem>>
    %c0_28 = arith.constant 0 : index
    %c127 = arith.constant 127 : index
    %49 = vector.load %arg5[%c0_28, %c127] : memref<2x512xf32, #tpu.memory_space<vmem>>, vector<1x256xf32>
    %50 = vector.broadcast %48 : f32 to vector<1x256xf32>
    %51 = arith.mulf %50, %49 : vector<1x256xf32>
    %c12 = arith.constant 12 : index
    %52 = memref.load %arg1[%c12] : memref<18xf32, #tpu.memory_space<smem>>
    %c1_29 = arith.constant 1 : index
    %c127_30 = arith.constant 127 : index
    %53 = vector.load %arg5[%c1_29, %c127_30] : memref<2x512xf32, #tpu.memory_space<vmem>>, vector<1x256xf32>
    %54 = vector.broadcast %52 : f32 to vector<1x256xf32>
    %55 = arith.mulf %54, %53 : vector<1x256xf32>
    %56 = arith.addf %51, %55 : vector<1x256xf32>
    %57 = arith.addf %27, %56 : vector<1x256xf32>
    %c4 = arith.constant 4 : index
    %58 = memref.load %arg1[%c4] : memref<18xf32, #tpu.memory_space<smem>>
    %c0_31 = arith.constant 0 : index
    %c128_32 = arith.constant 128 : index
    %59 = vector.load %arg5[%c0_31, %c128_32] : memref<2x512xf32, #tpu.memory_space<vmem>>, vector<1x256xf32>
    %60 = vector.broadcast %58 : f32 to vector<1x256xf32>
    %61 = arith.mulf %60, %59 : vector<1x256xf32>
    %c13 = arith.constant 13 : index
    %62 = memref.load %arg1[%c13] : memref<18xf32, #tpu.memory_space<smem>>
    %c1_33 = arith.constant 1 : index
    %c128_34 = arith.constant 128 : index
    %63 = vector.load %arg5[%c1_33, %c128_34] : memref<2x512xf32, #tpu.memory_space<vmem>>, vector<1x256xf32>
    %64 = vector.broadcast %62 : f32 to vector<1x256xf32>
    %65 = arith.mulf %64, %63 : vector<1x256xf32>
    %66 = arith.addf %61, %65 : vector<1x256xf32>
    %67 = arith.addf %37, %66 : vector<1x256xf32>
    %c5 = arith.constant 5 : index
    %68 = memref.load %arg1[%c5] : memref<18xf32, #tpu.memory_space<smem>>
    %c0_35 = arith.constant 0 : index
    %c129 = arith.constant 129 : index
    %69 = vector.load %arg5[%c0_35, %c129] : memref<2x512xf32, #tpu.memory_space<vmem>>, vector<1x256xf32>
    %70 = vector.broadcast %68 : f32 to vector<1x256xf32>
    %71 = arith.mulf %70, %69 : vector<1x256xf32>
    %c14 = arith.constant 14 : index
    %72 = memref.load %arg1[%c14] : memref<18xf32, #tpu.memory_space<smem>>
    %c1_36 = arith.constant 1 : index
    %c129_37 = arith.constant 129 : index
    %73 = vector.load %arg5[%c1_36, %c129_37] : memref<2x512xf32, #tpu.memory_space<vmem>>, vector<1x256xf32>
    %74 = vector.broadcast %72 : f32 to vector<1x256xf32>
    %75 = arith.mulf %74, %73 : vector<1x256xf32>
    %76 = arith.addf %71, %75 : vector<1x256xf32>
    %77 = arith.addf %47, %76 : vector<1x256xf32>
    %c6 = arith.constant 6 : index
    %78 = memref.load %arg1[%c6] : memref<18xf32, #tpu.memory_space<smem>>
    %c0_38 = arith.constant 0 : index
    %c143 = arith.constant 143 : index
    %79 = vector.load %arg5[%c0_38, %c143] : memref<2x512xf32, #tpu.memory_space<vmem>>, vector<1x256xf32>
    %80 = vector.broadcast %78 : f32 to vector<1x256xf32>
    %81 = arith.mulf %80, %79 : vector<1x256xf32>
    %c15 = arith.constant 15 : index
    %82 = memref.load %arg1[%c15] : memref<18xf32, #tpu.memory_space<smem>>
    %c1_39 = arith.constant 1 : index
    %c143_40 = arith.constant 143 : index
    %83 = vector.load %arg5[%c1_39, %c143_40] : memref<2x512xf32, #tpu.memory_space<vmem>>, vector<1x256xf32>
    %84 = vector.broadcast %82 : f32 to vector<1x256xf32>
    %85 = arith.mulf %84, %83 : vector<1x256xf32>
    %86 = arith.addf %81, %85 : vector<1x256xf32>
    %87 = arith.addf %57, %86 : vector<1x256xf32>
    %c7 = arith.constant 7 : index
    %88 = memref.load %arg1[%c7] : memref<18xf32, #tpu.memory_space<smem>>
    %c0_41 = arith.constant 0 : index
    %c144 = arith.constant 144 : index
    %89 = vector.load %arg5[%c0_41, %c144] : memref<2x512xf32, #tpu.memory_space<vmem>>, vector<1x256xf32>
    %90 = vector.broadcast %88 : f32 to vector<1x256xf32>
    %91 = arith.mulf %90, %89 : vector<1x256xf32>
    %c16 = arith.constant 16 : index
    %92 = memref.load %arg1[%c16] : memref<18xf32, #tpu.memory_space<smem>>
    %c1_42 = arith.constant 1 : index
    %c144_43 = arith.constant 144 : index
    %93 = vector.load %arg5[%c1_42, %c144_43] : memref<2x512xf32, #tpu.memory_space<vmem>>, vector<1x256xf32>
    %94 = vector.broadcast %92 : f32 to vector<1x256xf32>
    %95 = arith.mulf %94, %93 : vector<1x256xf32>
    %96 = arith.addf %91, %95 : vector<1x256xf32>
    %97 = arith.addf %67, %96 : vector<1x256xf32>
    %c8 = arith.constant 8 : index
    %98 = memref.load %arg1[%c8] : memref<18xf32, #tpu.memory_space<smem>>
    %c0_44 = arith.constant 0 : index
    %c145 = arith.constant 145 : index
    %99 = vector.load %arg5[%c0_44, %c145] : memref<2x512xf32, #tpu.memory_space<vmem>>, vector<1x256xf32>
    %100 = vector.broadcast %98 : f32 to vector<1x256xf32>
    %101 = arith.mulf %100, %99 : vector<1x256xf32>
    %c17 = arith.constant 17 : index
    %102 = memref.load %arg1[%c17] : memref<18xf32, #tpu.memory_space<smem>>
    %c1_45 = arith.constant 1 : index
    %c145_46 = arith.constant 145 : index
    %103 = vector.load %arg5[%c1_45, %c145_46] : memref<2x512xf32, #tpu.memory_space<vmem>>, vector<1x256xf32>
    %104 = vector.broadcast %102 : f32 to vector<1x256xf32>
    %105 = arith.mulf %104, %103 : vector<1x256xf32>
    %106 = arith.addf %101, %105 : vector<1x256xf32>
    %107 = arith.addf %77, %106 : vector<1x256xf32>
    %108 = arith.mulf %87, %13 : vector<1x256xf32>
    %109 = arith.addf %97, %108 : vector<1x256xf32>
    %110 = arith.mulf %107, %14 : vector<1x256xf32>
    %111 = arith.addf %109, %110 : vector<1x256xf32>
    %112 = arith.negf %111 : vector<1x256xf32>
    %113 = math.exp %112 : vector<1x256xf32>
    %cst_47 = arith.constant 1.000000e+00 : f32
    %114 = vector.broadcast %cst_47 : f32 to vector<1x256xf32>
    %115 = arith.addf %114, %113 : vector<1x256xf32>
    %116 = arith.divf %114, %115 : vector<1x256xf32>
    %117 = vector.shape_cast %116 : vector<1x256xf32> to vector<1x256xf32>
    %118 = vector.broadcast %117 : vector<1x256xf32> to vector<4x256xf32>
    %c0_48 = arith.constant 0 : index
    %c0_49 = arith.constant 0 : index
    %c0_50 = arith.constant 0 : index
    %119 = vector.load %arg3[%c0_48, %c0_49, %c0_50] : memref<1x4x256xf32, #tpu.memory_space<vmem>>, vector<1x4x256xf32>
    %120 = vector.shape_cast %119 : vector<1x4x256xf32> to vector<4x256xf32>
    %121 = arith.mulf %120, %118 : vector<4x256xf32>
    %c0_51 = arith.constant 0 : index
    %c0_52 = arith.constant 0 : index
    %c0_53 = arith.constant 0 : index
    %122 = vector.load %arg4[%c0_51, %c0_52, %c0_53] : memref<1x4x256xf32, #tpu.memory_space<vmem>>, vector<1x4x256xf32>
    %123 = vector.shape_cast %122 : vector<1x4x256xf32> to vector<4x256xf32>
    %124 = vector.shape_cast %121 : vector<4x256xf32> to vector<1x4x256xf32>
    tpu.vector_store %arg4[%c0_51, %c0_52, %c0_53], %124 {strides = array<i32>} : memref<1x4x256xf32, #tpu.memory_space<vmem>>, vector<1x4x256xf32>,
    return
  }
  func.func @transform_0(%arg0: i32) -> i32 {
    %c0_i32 = arith.constant 0 : i32
    %c0_i32_0 = arith.constant 0 : i32
    return %c0_i32 : i32
  }
  func.func @transform_1(%arg0: i32) -> (i32, i32) {
    %c0_i32 = arith.constant 0 : i32
    %c0_i32_0 = arith.constant 0 : i32
    %c0_i32_1 = arith.constant 0 : i32
    return %c0_i32, %c0_i32_0 : i32, i32
  }
  func.func @transform_2(%arg0: i32) -> (i32, i32, i32) {
    %c0_i32 = arith.constant 0 : i32
    %c0_i32_0 = arith.constant 0 : i32
    %c0_i32_1 = arith.constant 0 : i32
    return %arg0, %c0_i32, %c0_i32_0 : i32, i32, i32
  }
  func.func @transform_3(%arg0: i32) -> (i32, i32, i32) {
    %c0_i32 = arith.constant 0 : i32
    %c0_i32_0 = arith.constant 0 : i32
    %c0_i32_1 = arith.constant 0 : i32
    return %arg0, %c0_i32, %c0_i32_0 : i32, i32, i32
  }
}

</mosaic_0001>

<bundles_post_ra>
// kernel: tpu_custom_call.1
= control target key start
LH: loop header
LB: loop body
LE: loop exit
PB: predicated region body
PF: predicated region fallthrough
CT: control target
= control target key end

     0   :  { %8 = vsyncpa [#allocation6], 0  ;;  %s1131_s0 = inlined_call_operand.hbm [shape: f32[18], index: 0, kind: input, shape index: {}]   ;;  %s1132_s1 = inlined_call_operand.hbm [shape: f32[2,256], index: 1, kind: input, shape index: {}]   ;;  %s1133_s2 = inlined_call_operand.hbm [shape: f32[2,4,256], index: 2, kind: input, shape index: {}]   ;;  %s1134_s3 = inlined_call_operand.hbm [shape: f32[2,4,256], index: 3, kind: output, shape index: {}]  }
   0x1   :  { %9 = vsyncpa [#allocation4], 0 }
   0x2   :  { %10 = vsyncpa [#allocation9], 0 }
   0x3   :  { %12 = vsyncpa [#allocation9 + $0x1], 0 }
   0x4   :  { %13 = vsyncpa [#allocation5], 0 }
   0x5   :  { %15 = vsyncpa [#allocation5 + $0x1], 0  ;;  %s880_s12 = smov 0   ;;  %s882_s13 = smov 0  }
   0x6   :  { %s884_s14 = smov 0   ;;  %s886_s15 = smov 0  }
   0x7 LB: > { %s901_s16 = sadd.s32 4294967295, %s845_s15   ;;  %s589_s17 = sadd.s32 4294967294, %s845_s15   ;;  %s845_s15 = sphi %s886_s15, %s1158_s15   ;;  %s841_s14 = sphi %s884_s14, %s1157_s14   ;;  %s837_s13 = sphi %s882_s13, %s1156_s13   ;;  %s833_s12 = sphi %s880_s12, %s1155_s12  }
   0x8   : > { %p83_p0 = scmp.ne.s32.totalorder %s837_s13, %s833_s12  ;;  %p1135_p1 = scmp.eq.s32.totalorder %s901_s16, 0 }
   0x9   : > { %p107_p2 = scmp.eq.s32.totalorder %s901_s16, 1  ;;  %p113_p3 = scmp.eq.s32.totalorder %s589_s17, 1 }
   0xa   : > { %p910_p4 = por %p1135_p1, %p83_p0  ;;  %p590_p5 = scmp.ge.s32.totalorder %s845_s15, 1 }
   0xb   : > { %p915_p6 = por %p113_p3, %p83_p0  ;;  %p120_p7 = scmp.lt.s32.totalorder %s845_s15, 3 }
   0xc   : > { %s1139_s18 = scalar_select %p910_p4, 1, 0 }
   0xd   : > { %s1140_s19 = scalar_select %p915_p6, 1, 0 }
   0xe   : > { %p920_p8 = pnand %p590_p5, %p120_p7  ;;  %s847_s21 = smov [#allocation7]  }
   0xf   : > { %s142_s22 = sshll.u32 %s847_s21, 4  ;;  %s934_s24 = sadd.s32 1, %s845_s15   ;;  %s143_s22 = int_to_ptr.vmem [resolvable:$true] %s142_s22 }
  0x10   : > { %s1141_s20 = scalar_select %p920_p8, 1, 0 }
  0x11   : > { %p639_p10 = pneg %p920_p8  ;;  %s67_s25 = ssub.s32 %s845_s15, %s934_s24 }
  0x12   : > { %s70_s26 = sadd.s32 1, %s841_s14  ;;  %p939_p12 = scmp.eq.s32.totalorder %s67_s25, 0 }
  0x13   : > { %p929_p11 = pnand %p639_p10, %p1135_p1  ;;  %s848_s28 = smov [#allocation3]  }
  0x14   : > { %s730_s4 = scalar_lea.vmem %s143_s22, 64  ;;  %p738_p7 = scmp.lt.s32.totalorder %s143_s22, %s143_s22 }
  0x15   : > { %642 = dma.hbm_to_smem (!%p929_p11), %s1131_s0, 16, %s848_s28, [#allocation6]  }
  0x16   : > { %p721_p13 = pneg %p929_p11  ;;  %p731_p0 = scmp.ne.s32.totalorder %s143_s22, %s730_s4 }
  0x17   : > { %p739_p10 = scmp.lt.s32.totalorder %s730_s4, %s730_s4 }
  0x18   : > { %p733_p3 = pnand %p731_p0, %p721_p13 }
  0x19   : > { %p740_p9 = por %p739_p10, %p738_p7 }
  0x1a   : > { %p734_p5 = pneg %p733_p3 }
  0x1c   : > { %p741_p1 = pnand %p740_p9, %p734_p5 }
  0x1e   : > { %744 = shalt.err (!%p741_p1)
}
  0x1f   : > { %645 = dma.hbm_to_vmem [thread:$0]  (!%p929_p11), %s1132_s1, 64, %s143_s22, [#allocation4]  }
  0x20   : > { %s958_s7 = scalar_select %p939_p12, %s841_s14, %s70_s26  }
  0x21   : > { %p77_p9 = scmp.ne.s32.totalorder %s841_s14, %s837_s13  ;;  %p78_p1 = scmp.eq.s32.totalorder %s845_s15, 0 }
  0x22   : > { %p656_p13 = scmp.lt.s32.totalorder %s845_s15, 2  ;;  %s153_s8 = sand.u32 1, %s841_s14  }
  0x23   : > { %p79_p0 = por %p78_p1, %p77_p9  ;;  %p967_p3 = por %p107_p2, %p77_p9 }
  0x24   : > { %s594_s10 = sshll.u32 %s153_s8, 3  ;;  %s625_s11 = sshll.u32 %s845_s15, 7 }
  0x25   : > { %s1144_s9 = scalar_select %p967_p3, 1, 0 }
  0x26   : > { %s975_s23 = scalar_lea.hbm %s1133_s2, %s625_s11  ;;  %s157_s22 = scalar_lea.vmem [#allocation8], %s594_s10 }
  0x27   : > { %s165_s25 = sshll.u32 %s157_s22, 4  ;;  %p977_p11 = pnand %p656_p13, %p79_p0  ;;  %s166_s25 = int_to_ptr.vmem [resolvable:$true] %s165_s25 }
  0x28   : > { %s154_s27 = scalar_lea.sflag [#allocation9], %s153_s8  ;;  %s745_s28 = scalar_lea.hbm %s975_s23, 128 }
  0x29   : > { %p746_p2 = scmp.ne.s32.totalorder %s975_s23, %s745_s28  ;;  %p747_p12 = pneg %p977_p11 }
  0x2a   : > { %s750_s4 = scalar_lea.hbm %s1133_s2, 256  ;;  %p751_p10 = scmp.lt.s32.totalorder %s975_s23, %s1133_s2 }
  0x2b   : > { %p748_p5 = pnand %p747_p12, %p746_p2  ;;  %p752_p9 = scmp.lt.s32.totalorder %s750_s4, %s745_s28 }
  0x2d   : > { %p749_p7 = pneg %p748_p5  ;;  %p753_p1 = por %p752_p9, %p751_p10 }
  0x2f   : > { %p754_p13 = pnand %p753_p1, %p749_p7 }
  0x31   : > { %757 = shalt.err (!%p754_p13)
}
  0x32   : > { %s758_s10 = scalar_lea.vmem %s166_s25, 128  ;;  %s849_s8 = smov [#allocation8]  }
  0x33   : > { %p759_p0 = scmp.ne.s32.totalorder %s166_s25, %s758_s10  ;;  %s763_s11 = sshll.u32 %s849_s8, 4  ;;  %s764_s11 = int_to_ptr.vmem [resolvable:$false] %s763_s11 }
  0x34   : > { %s765_s17 = scalar_lea.vmem %s764_s11, 256  ;;  %p766_p2 = scmp.lt.s32.totalorder %s166_s25, %s764_s11 }
  0x35   : > { %p761_p6 = pnand %p759_p0, %p747_p12  ;;  %p767_p5 = scmp.lt.s32.totalorder %s765_s17, %s758_s10 }
  0x37   : > { %p762_p3 = pneg %p761_p6  ;;  %p768_p4 = por %p767_p5, %p766_p2 }
  0x39   : > { %p769_p8 = pnand %p768_p4, %p762_p3 }
  0x3b   : > { %772 = shalt.err (!%p769_p8)
}
  0x3c   : > { %649 = dma.hbm_to_vmem [thread:$0]  (!%p977_p11), %s975_s23, 128, %s166_s25, %s154_s27  }
  0x3d   : > { %p1146_p7 = scmp.ne.s32.totalorder %s1141_s20, 0 }
  0x3e   : > { %p1147_p10 = scmp.eq.s32.totalorder (!%p1146_p7), %s901_s16, 0 }
  0x3f   : > { %174 = sbr.rel (%p1146_p7) target bundleno = 536 (0x218), region = 32 }
  0x44   : > { %816 = dma.done.wait (%p1147_p10), [#allocation6], 16   ;;  %p1148_p6 = pmov %p1147_p10 }
  0x46   : > { %818 = vsyncadd (%p1148_p6), [#allocation6], 4294967280  ;;  %p1149_p12 = pmov %p1148_p6 }
  0x47   : > { %p1150_p9 = pmov %p1148_p6 }
  0x48   : > { %820 = dma.done.wait (%p1149_p12), [#allocation4], 64  }
  0x49   : > { %822 = vsyncadd (%p1150_p9), [#allocation4], 4294967232  ;;  %s1006_s21 = sand.u32 1, %s837_s13   ;;  %p1151_p4 = scmp.ne.s32.totalorder %s1139_s18, 0 }
  0x4a   : > { %s600_s20 = sshll.u32 %s1006_s21, 3  ;;  %s185_s23 = scalar_lea.sflag [#allocation9], %s1006_s21 }
  0x4b   : > { %s188_s22 = scalar_lea.vmem [#allocation8], %s600_s20 }
  0x4c   : > { %824 = dma.done.wait (%p1151_p4), %s185_s23, 128  }
  0x4d   : > { %826 = vsyncadd (%p1151_p4), %s185_s23, 4294967168 }
  0x4e   : > { %193 = sfence }
  0x4f   : > { %v1016_v0 = vld [vmem:[%s188_s22] sm:$0xff]  ;;  %vm216_vm0 = vcmask 1043456   ;;  %v850_v4 = vmov 0.0   ;;  %v851_v13 = vmov 1966171168   ;;  %v255_v15 = vlaneseq  ;;  %s1028_s18 = sld [smem:[#allocation3 + $0x6]] }
  0x50   : > { %v214_v1 = vcombine.high %v1016_v0, %v1016_v0  ;;  %v217_v2 = vsel %vm216_vm0, %v1016_v0, -inf  ;;  %v231_v3 = vsel %vm216_vm0, %v1016_v0, 0.0  ;;  %248 = vst [vmem:[#allocation2 + $0x6] sm:$0x3] %v850_v4  ;;  %247 = vst [vmem:[#allocation2] sm:$0x3] %v850_v4  ;;  %v253_v14 = vunpack.c.l.s4 %v851_v13 }
  0x51   : > { %v218_v5 = vrot.slane %v217_v2, 4  ;;  %v232_v6 = vrot.slane %v231_v3, 4  ;;  %v1026_v25 = vshrl.u32 %v255_v15, 7  ;;  %s1030_s25 = sld [smem:[#allocation3 + $0xf]]  ;;  %vm269_vm1 = vcmp.lt.s32.totalorder %v255_v15, 256  ;;  %p1152_p3 = scmp.ne.s32.totalorder %s1144_s9, 0 }
  0x52   : > { %v224_v7 = vsel %vm216_vm0, %v214_v1, -inf  ;;  %v238_v8 = vsel %vm216_vm0, %v214_v1, 0.0  ;;  %v254_v24 = vunpack.c.0.s8 %v253_v14  ;;  %s1032_s26 = sld [smem:[#allocation3 + $0x3]]  ;;  %vm334_vm2 = vcmask 916480  }
  0x53   : > { %v219_v9 = vmax.f32 %v217_v2, %v218_v5  ;;  %v225_v10 = vrot.slane %v224_v7, 4  ;;  %v233_v11 = vadd.f32 %v232_v6, %v231_v3  ;;  %v239_v12 = vrot.slane %v238_v8, 4  ;;  %s1035_s27 = sld [smem:[#allocation3 + $0xc]] }
  0x54   : > { %v257_v37 = vsub.s32 %v254_v24, %v1026_v25  ;;  %s1037_s28 = sld [smem:[#allocation3 + $0x8]]  ;;  %vm383_vm3 = vcmask 785408   ;;  %vm435_vm4 = vcmask 924672   ;;  %vm419_vm5 = vcmask 908288  }
  0x55   : > { %v220_v16 = vrot.slane %v219_v9, 2  ;;  %v226_v17 = vmax.f32 %v224_v7, %v225_v10  ;;  %v234_v18 = vrot.slane %v233_v11, 2  ;;  %v240_v19 = vadd.f32 %v239_v12, %v238_v8  ;;  %s1039_s29 = sld [smem:[#allocation3 + $0x11]] }
  0x56   : > { %s1041_s30 = sld [smem:[#allocation3 + $0x5]]  ;;  %v373_v45 = vstv %s1028_s18  ;;  %s852_s18 = smov 96   ;;  %vm427_vm6 = vcmask 7168   ;;  %vm443_vm7 = vcmask 1039360   ;;  %vm475_vm8 = vcmask 130048  }
  0x57   : > { %v221_v20 = vmax.f32 %v219_v9, %v220_v16  ;;  %v227_v21 = vrot.slane %v226_v17, 2  ;;  %v235_v22 = vadd.f32 %v234_v18, %v233_v11  ;;  %v241_v23 = vrot.slane %v240_v19, 2  ;;  %s1043_s4 = sld [smem:[#allocation3 + $0xe]] }
  0x58   : > { %s1045_s5 = sld [smem:[#allocation3]]  ;;  %v324_v46 = vstv %s1032_s26  ;;  %v376_v52 = vstv %s1030_s25  ;;  %s853_s25 = smov 112  }
  0x59   : > { %v222_v26 = vrot.slane %v221_v20, 1  ;;  %v228_v27 = vmax.f32 %v226_v17, %v227_v21  ;;  %v236_v28 = vrot.slane %v235_v22, 1  ;;  %v242_v29 = vadd.f32 %v241_v23, %v240_v19  ;;  %s1047_s6 = sld [smem:[#allocation3 + $0x2]] }
  0x5a   : > { %s1049_s10 = sld [smem:[#allocation3 + $0x9]]  ;;  %v402_v47 = vstv %s1037_s28  ;;  %v327_v54 = vstv %s1035_s27  ;;  %s854_s28 = smov 113  }
  0x5b   : > { %v223_v30 = vmax.f32 %v221_v20, %v222_v26  ;;  %v229_v31 = vrot.slane %v228_v27, 1  ;;  %v237_v32 = vadd.f32 %v236_v28, %v235_v22  ;;  %v243_v33 = vrot.slane %v242_v29, 1  ;;  %s1051_s8 = sld [smem:[#allocation3 + $0xb]]  ;;  %v293_v28 = vld [vmem:[#allocation7] ss:$2 sm:$0x3] }
  0x5c   : > { %s1053_s11 = sld [smem:[#allocation3 + $0x4]]  ;;  %v357_v48 = vstv %s1041_s30  ;;  %v405_v55 = vstv %s1039_s29  ;;  %s855_s29 = smov 111  }
  0x5d   : > { %v230_v34 = vmax.f32 %v228_v27, %v229_v31  ;;  %v244_v35 = vadd.f32 %v243_v33, %v242_v29  ;;  %v245_v36 = vmul.f32 0.25, %v237_v32  ;;  %s1055_s17 = sld [smem:[#allocation3 + $0xd]]  ;;  %v362_v56 = vstv %s1043_s4  ;;  %v295_v27 = vld [vmem:[#allocation7 + $0x1] ss:$2 sm:$0x3]  ;;  %s856_s30 = smov 127  }
  0x5e   : > { %s1059_s23 = sld [smem:[#allocation3 + $0x7]]  ;;  %v298_v49 = vstv %s1045_s5  ;;  %s857_s4 = smov 1  }
  0x5f   : > { %v246_v38 = vmul.f32 0.25, %v244_v35  ;;  %v251_v39 = vcombine.low %v223_v30, %v230_v34  ;;  %v316_v50 = vstv %s1047_s6  ;;  %s1065_s22 = sld [smem:[#allocation3 + $0x10]]  ;;  %s858_s5 = smov 16  }
  0x60   : > { %v303_v59 = vstv %s1049_s10  ;;  %s603_s26 = sld [smem:[#allocation3 + $0x1]]  ;;  %s626_s6 = sshll.u32 %s901_s16, 7 }
  0x61   : > { %v258_v40 = vrot.slane %v251_v39, %v257_v37  ;;  %v275_v41 = vcombine.low %v245_v36, %v246_v38  ;;  %v319_v60 = vstv %s1051_s8  ;;  %s604_s27 = sld [smem:[#allocation3 + $0xa]]  ;;  %s211_s10 = scalar_lea.vmem [#allocation10], %s600_s20 }
  0x62   : > { %v340_v17 = vstv %s1053_s11  ;;  %s495_s8 = sshll.u32 %s211_s10, 4  ;;  %s859_s16 = smov [#allocation10]   ;;  %s496_s8 = int_to_ptr.vmem [resolvable:$true] %s495_s8 }
  0x63   : > { %v265_v42 = vrot.slane %v258_v40, %v257_v37  ;;  %v282_v43 = vrot.slane %v275_v41, %v257_v37  ;;  %v344_v19 = vstv %s1055_s17  ;;  %s777_s20 = sshll.u32 %s859_s16, 4  ;;  %s778_s20 = int_to_ptr.vmem [resolvable:$false] %s777_s20 }
  0x64   : > { %v388_v20 = vstv %s1059_s23  ;;  %s493_s23 = scalar_lea.hbm %s1134_s3, %s626_s6  ;;  %p780_p13 = scmp.lt.s32.totalorder %s496_s8, %s778_s20 }
  0x65   : > { %272 = vst.msk [vmem:[#allocation2 + $0x2] ss:$2 sm:$0x3] %vm269_vm1, %v265_v42  ;;  %v289_v44 = vrot.slane %v282_v43, %v257_v37  ;;  %v391_v21 = vstv %s1065_s22  ;;  %s481_s22 = scalar_lea.sflag [#allocation5], %s1006_s21 }
  0x66   : > { %v308_v29 = vstv %s603_s26 }
  0x67   : > { %292 = vst.msk [vmem:[#allocation2 + $0x3] ss:$2 sm:$0x3] %vm269_vm1, %v289_v44  ;;  %v311_v30 = vstv %s604_s27 }
  0x6c   : > { %v356_v51 = vld [vmem:[#allocation2 + $0x2] ss:$2 sm:$0x7] }
  0x6d   : > { %v297_v53 = vld [vmem:[#allocation2] ss:$2 sm:$0x7]  ;;  %v374_v57 = vmul.f32 %v373_v45, %v356_v51  ;;  %v403_v63 = vmul.f32 %v402_v47, %v356_v51  ;;  %v358_v1 = vmul.f32 %v357_v48, %v356_v51  ;;  %v389_v24 = vmul.f32 %v388_v20, %v356_v51 }
  0x6e   : > { %v325_v58 = vmul.f32 %v324_v46, %v297_v53  ;;  %v361_v61 = vld [vmem:[#allocation2 + $0x3] ss:$2 sm:$0x7]  ;;  %v299_v2 = vmul.f32 %v298_v49, %v297_v53  ;;  %v317_v3 = vmul.f32 %v316_v50, %v297_v53  ;;  %v339_v16 = vld [vmem:[#allocation2 + $0x2] ss:$2 sm:$0x3]  ;;  %v309_v31 = vmul.f32 %v308_v29, %v297_v53 }
  0x6f   : > { %v302_v62 = vld [vmem:[#allocation2 + $0x1] ss:$2 sm:$0x7]  ;;  %v377_v4 = vmul.f32 %v376_v52, %v361_v61  ;;  %v406_v6 = vmul.f32 %v405_v55, %v361_v61  ;;  %v363_v7 = vmul.f32 %v362_v56, %v361_v61  ;;  %v341_v22 = vmul.f32 %v340_v17, %v339_v16 }
  0x70   : > { %v328_v5 = vmul.f32 %v327_v54, %v302_v62  ;;  %v304_v8 = vmul.f32 %v303_v59, %v302_v62  ;;  %v320_v9 = vmul.f32 %v319_v60, %v302_v62  ;;  %v343_v18 = vld [vmem:[#allocation2 + $0x3] ss:$2 sm:$0x3]  ;;  %v392_v26 = vmul.f32 %v391_v21, %v361_v61 }
  0x71   : > { %v378_v10 = vadd.f32 %v377_v4, %v374_v57  ;;  %v407_v14 = vadd.f32 %v406_v6, %v403_v63  ;;  %v364_v15 = vadd.f32 %v363_v7, %v358_v1  ;;  %v345_v23 = vmul.f32 %v344_v19, %v343_v18 }
  0x72   : > { %v329_v11 = vadd.f32 %v328_v5, %v325_v58  ;;  %v305_v12 = vadd.f32 %v304_v8, %v299_v2  ;;  %v321_v13 = vadd.f32 %v320_v9, %v317_v3  ;;  %v393_v33 = vadd.f32 %v392_v26, %v389_v24 }
  0x73   : > { %380 = vrot.lane.b32.xlu1 %v378_v10, %s852_s18  ;;  %v346_v32 = vadd.f32 %v345_v23, %v341_v22  ;;  %v312_v34 = vmul.f32 %v311_v30, %v302_v62  ;;  %v464_v16 = vsub.s32 2, %v1026_v25  ;;  %v456_v17 = vsub.s32 0, %v1026_v25 }
  0x74   : > { %331 = vrot.lane.b32.xlu0 %v329_v11, %s853_s25  ;;  %v460_v18 = vsub.s32 1, %v1026_v25 }
  0x75   : > { %v313_v35 = vadd.f32 %v312_v34, %v309_v31 }
  0x77   : > { %409 = vrot.lane.b32.xlu1 %v407_v14, %s852_s18 }
  0x78   : > { %366 = vrot.lane.b32.xlu0 %v364_v15, %s853_s25 }
  0x7b   : > { %432 = vrot.lane.b32.xlu1 %v295_v27, %s854_s28 }
  0x7c   : > { %416 = vrot.lane.b32.xlu0 %v293_v28, %s855_s29 }
  0x7f   : > { %395 = vrot.lane.b32.xlu1 %v393_v33, %s852_s18  ;;  %s773_s18 = scalar_lea.vmem %s496_s8, 128 }
  0x80   : > { %348 = vrot.lane.b32.xlu0 %v346_v32, %s853_s25  ;;  %p774_p8 = scmp.ne.s32.totalorder %s496_s8, %s773_s18  ;;  %s779_s25 = scalar_lea.vmem %s778_s20, 256 }
  0x81   : > { %p781_p0 = scmp.lt.s32.totalorder %s779_s25, %s773_s18 }
  0x82   : > { %p775_p11 = pnand %p774_p8, %p1152_p3 }
  0x83   : > { %p782_p2 = por %p781_p0, %p780_p13 }
  0x84   : > { %p776_p1 = pneg %p775_p11 }
  0x86   : > { %p783_p5 = pnand %p782_p2, %p776_p1 }
  0xe5   : > { %v381_v36 = vpop.permute.xlu1 %380 }
  0xe6   : > { %v332_v37 = vpop.permute.xlu0 %331  ;;  %v382_v42 = vrot.slane %v381_v36, 7 }
  0xe7   : > { %v333_v38 = vrot.slane %v332_v37, 1 }
  0xe8   : > { %v384_v50 = vsel %vm383_vm3, %v382_v42, %v381_v36 }
  0xe9   : > { %v335_v39 = vsel %vm334_vm2, %v332_v37, %v333_v38  ;;  %v410_v40 = vpop.permute.xlu1 %409 }
  0xea   : > { %v367_v41 = vpop.permute.xlu0 %366  ;;  %v411_v43 = vrot.slane %v410_v40, 7  ;;  %v337_v45 = vadd.f32 %v335_v39, %v305_v12 }
  0xeb   : > { %v368_v44 = vrot.slane %v367_v41, 7 }
  0xec   : > { %v412_v51 = vsel %vm383_vm3, %v411_v43, %v410_v40  ;;  %v386_v55 = vadd.f32 %v384_v50, %v337_v45 }
  0xed   : > { %v369_v46 = vsel %vm334_vm2, %v368_v44, %v367_v41  ;;  %v433_v48 = vpop.permute.xlu1 %432 }
  0xee   : > { %v371_v47 = vadd.f32 %v369_v46, %v321_v13  ;;  %v417_v49 = vpop.permute.xlu0 %416  ;;  %v434_v52 = vrot.slane %v433_v48, 7 }
  0xef   : > { %v418_v53 = vrot.slane %v417_v49, 7 }
  0xf0   : > { %v414_v54 = vadd.f32 %v412_v51, %v371_v47  ;;  %v436_v56 = vsel %vm435_vm4, %v434_v52, %v433_v48 }
  0xf1   : > { %v420_v57 = vsel %vm419_vm5, %v418_v53, %v417_v49  ;;  %v396_v61 = vpop.permute.xlu1 %395 }
  0xf2   : > { %v438_v58 = vmul.f32 %v436_v56, %v414_v54  ;;  %v422_v59 = vmul.f32 %v420_v57, %v386_v55  ;;  %v349_v60 = vpop.permute.xlu0 %348  ;;  %v397_v63 = vrot.slane %v396_v61, 7 }
  0xf3   : > { %v350_v62 = vrot.slane %v349_v60, 7 }
  0xf4   : > { %440 = vrot.lane.b32.xlu1 %v438_v58, %s856_s30  ;;  %424 = vrot.lane.b32.xlu0 %v422_v59, %s857_s4  ;;  %v398_v2 = vsel %vm383_vm3, %v397_v63, %v396_v61 }
  0xf5   : > { %v351_v1 = vsel %vm334_vm2, %v350_v62, %v349_v60 }
  0xf6   : > { %v353_v3 = vadd.f32 %v351_v1, %v313_v35 }
  0xf8   : > { %v400_v4 = vadd.f32 %v398_v2, %v353_v3 }
 0x166   : > { %v441_v5 = vpop.permute.xlu1 %440  ;;  %v425_v6 = vpop.permute.xlu0 %424 }
 0x167   : > { %v442_v7 = vrot.slane %v441_v5, 1  ;;  %v426_v8 = vrot.slane %v425_v6, 7 }
 0x169   : > { %v428_v9 = vsel %vm427_vm6, %v426_v8, %v425_v6  ;;  %v444_v11 = vsel %vm443_vm7, %v441_v5, %v442_v7 }
 0x16a   : > { %v430_v10 = vadd.f32 %v428_v9, %v400_v4 }
 0x16c   : > { %v446_v12 = vadd.f32 %v444_v11, %v430_v10 }
 0x16e   : > { %v619_v13 = vmul.f32 -1.442695, %v446_v12 }
 0x170   : > { %704 = vpow2.f32 %v619_v13 }
 0x17d   : > { %v705_v14 = vpop.eup %704 }
 0x17e   : > { %v450_v15 = vadd.f32 1.0, %v705_v14 }
 0x180   : > { %706 = vrcp.f32 %v450_v15 }
 0x18d   : > { %v707_v19 = vpop.eup %706 }
 0x18e   : > { %v465_v20 = vrot.slane %v707_v19, %v464_v16  ;;  %v457_v21 = vrot.slane %v707_v19, %v456_v17  ;;  %v461_v22 = vrot.slane %v707_v19, %v460_v18 }
 0x190   : > { %470 = vrot.lane.b32.xlu1 %v465_v20, %s858_s5  ;;  %v467_v23 = vcombine.low %v457_v21, %v461_v22 }
 0x192   : > { %468 = vrot.lane.b32.xlu0 %v467_v23, %s858_s5 }
 0x202   : > { %v471_v24 = vpop.permute.xlu1 %470 }
 0x203   : > { %v473_v27 = vrot.slane %v471_v24, 4 }
 0x204   : > { %v469_v26 = vpop.permute.xlu0 %468 }
 0x205   : > { %v472_v28 = vrot.slane %v469_v26, 4 }
 0x207   : > { %v474_v25 = vsel %vm216_vm0, %v472_v28, %v473_v27 }
 0x208   : > { %v476_v29 = vsel %vm475_vm8, %v469_v26, %v474_v25 }
 0x209   : > { %v478_v30 = vmul.f32 %v476_v29, %v1016_v0 }
 0x20b   : > { %479 = vst [vmem:[%s211_s10] sm:$0xff] %v478_v30 }
 0x20c   : > { %786 = shalt.err (!%p783_p5)
}
 0x20d   : > { %s787_s26 = scalar_lea.hbm %s493_s23, 128  ;;  %s791_s28 = scalar_lea.hbm %s1134_s3, 256 }
 0x20e   : > { %p788_p7 = scmp.ne.s32.totalorder %s493_s23, %s787_s26  ;;  %p792_p12 = scmp.lt.s32.totalorder %s493_s23, %s1134_s3 }
 0x20f   : > { %p793_p9 = scmp.lt.s32.totalorder %s791_s28, %s787_s26 }
 0x210   : > { %p789_p10 = pnand %p788_p7, %p1152_p3 }
 0x211   : > { %p794_p4 = por %p793_p9, %p792_p12 }
 0x212   : > { %p790_p6 = pneg %p789_p10 }
 0x214   : > { %p795_p8 = pnand %p794_p4, %p790_p6 }
 0x216   : > { %798 = shalt.err (!%p795_p8)
}
 0x217   : > { %637 = dma.vmem_to_hbm [thread:$0]  (%p1152_p3), %s496_s8, 128, %s493_s23, %s481_s22  }
 0x218 PF: > { %s507_s4 = sand.u32 1, %s833_s12   ;;  %p1153_p11 = scmp.ne.s32.totalorder %s1140_s19, 0 }
 0x219   : > { %p1154_p1 = scmp.ge.s32.totalorder %s845_s15, 2  ;;  %s508_s5 = scalar_lea.sflag [#allocation5], %s507_s4 }
 0x21b   : > { %p651_p13 = pnand %p1154_p1, %p1153_p11 }
 0x21d   : > { %p652_p0 = pneg %p651_p13 }
 0x21f   : > { %828 = dma.done.wait (%p652_p0), %s508_s5, 128  }
 0x220   : > { %830 = vsyncadd (%p652_p0), %s508_s5, 4294967168  ;;  %p18_p2 = scmp.ge.s32.totalorder %s934_s24, 4   ;;  %s1155_s12 = smov %s837_s13 }
 0x221   : > { %s1156_s13 = smov %s841_s14  ;;  %s1157_s14 = smov %s958_s7 }
 0x222   : > { %s1158_s15 = smov %s934_s24  ;;  %20 = sbr.rel (!%p18_p2) target bundleno = 7 (0x7), region = 93 }
 0x227   :  { %513 = vsyncpa [#allocation4], 1 }
 0x228   :  { %515 = vsyncpa [#allocation4 + $0x1], 1 }
 0x229   :  { %516 = vsyncpa [#allocation9], 1 }
 0x22a   :  { %518 = vsyncpa [#allocation9 + $0x1], 1 }
 0x22b   :  { %519 = vsyncpa [#allocation5], 1 }
 0x22c   :  { %521 = vsyncpa [#allocation5 + $0x1], 1 }
 0x22d   :  { %522 = vsyncpa [#allocation6], 1 }
 0x22e   :  { %524 = vsyncpa [#allocation6 + $0x1], 1 }

</bundles_post_ra>
